<compile_context>
chip_gen: v7x
topology: tpu7x:2x2x1
jax: 0.10.0
libtpu: 0.0.40
codegen_flags: <defaults>
</compile_context>

<pallas_src>
import functools

import jax
import jax.numpy as jnp
from jax.experimental import pallas as pl
from jax.experimental.pallas import tpu as pltpu

ALPHA = 0.25
GAMMA = 2.0  # integer-valued -> use explicit repeated multiply, not pow()


def _focal_loss_kernel(x_ref, t_ref, out_ref, acc_ref):
    i = pl.program_id(1)  # inner (reduction) axis

    @pl.when(i == 0)
    def _():
        acc_ref[...] = jnp.zeros_like(acc_ref)

    x = x_ref[...].astype(jnp.float32)
    t = t_ref[...].astype(jnp.float32)

    # Numerically-stable BCE-with-logits (matches F.binary_cross_entropy_with_logits):
    #   bce = max(x, 0) - x*t + log(1 + exp(-|x|))
    bce = jnp.maximum(x, 0.0) - x * t + jnp.log1p(jnp.exp(-jnp.abs(x)))

    at = ALPHA * t + (1.0 - ALPHA) * (1.0 - t)
    pt = jnp.exp(-bce)
    d = 1.0 - pt
    # gamma == 2: explicit square instead of pow() (avoids 2 extra EUP
    # transcendentals per element and any log(0) path when pt == 1).
    f_loss = at * (d * d) * bce

    # Keep the partial sum vreg-shaped: (tile_rows, 128) -> (tile_rows//8, 8, 128)
    # -> sum over the leading axis (pure VPU adds). No per-step XLU reduce, no
    # loop-carried scalar dependency.
    acc_ref[...] += f_loss.reshape(-1, 8, 128).sum(axis=0)

    @pl.when(i == pl.num_programs(1) - 1)
    def _():
        out_ref[...] = acc_ref[...].reshape(1, 8, 128)


def _pick_tile_rows(rows, max_rows=1024):
    """Largest multiple of 8 that divides `rows` and is <= max_rows.

    ~1K rows x 128 lanes x f32 = 512 KiB per input tile; with 2 inputs x
    2-deep pipelining that's ~2 MiB resident -- comfortable on v5e/v6e (128 MiB
    VMEM) and v7x (64 MiB).
    """
    best = 8
    t = 8
    limit = min(rows, max_rows)
    while t <= limit:
        if rows % t == 0:
            best = t
        t += 8
    return best


@functools.partial(jax.jit, static_argnames=("cast_bf16",))
def focal_loss_mean(inputs, targets, *, cast_bf16=False):
    """inputs, targets: arrays of identical shape (e.g. NCHW).

    Returns the scalar mean focal loss (alpha=0.25, gamma=2.0), matching the
    PyTorch FocalLoss module with reduction='mean'.
    """
    assert inputs.shape == targets.shape
    numel = inputs.size
    lanes = 128
    # TODO(synk): generalize to numel not divisible by 8*128 via a masked tail
    # tile (padding must be excluded from both the sum and the divisor).
    assert numel % (8 * lanes) == 0, "wrapper assumes numel divisible by 8*128"
    rows = numel // lanes

    in_dtype = jnp.bfloat16 if cast_bf16 else jnp.float32
    x2 = inputs.reshape(rows, lanes).astype(in_dtype)
    t2 = targets.reshape(rows, lanes).astype(in_dtype)

    tile_rows = _pick_tile_rows(rows)
    num_tiles = rows // tile_rows

    # Leading "parallel" axis: shard the reduction across 2 TensorCores on v7x.
    # Harmless (serial) on 1-TC chips; skipped when there is only one tile.
    split = 2 if (num_tiles >= 2 and num_tiles % 2 == 0) else 1
    tiles_per_split = num_tiles // split

    itemsize = jnp.dtype(in_dtype).itemsize
    cost = pl.CostEstimate(
        flops=15 * numel,
        transcendentals=3 * numel,
        bytes_accessed=2 * numel * itemsize + split * 8 * lanes * 4,
    )

    partials = pl.pallas_call(
        _focal_loss_kernel,
        out_shape=jax.ShapeDtypeStruct((split, 8, lanes), jnp.float32),
        grid_spec=pltpu.PrefetchScalarGridSpec(
            num_scalar_prefetch=0,
            grid=(split, tiles_per_split),
            in_specs=[
                pl.BlockSpec(
                    (tile_rows, lanes),
                    lambda s, i: (s * tiles_per_split + i, 0),
                ),
                pl.BlockSpec(
                    (tile_rows, lanes),
                    lambda s, i: (s * tiles_per_split + i, 0),
                ),
            ],
            out_specs=pl.BlockSpec((1, 8, lanes), lambda s, i: (s, 0, 0)),
            scratch_shapes=[pltpu.VMEM((8, lanes), jnp.float32)],
        ),
        compiler_params=pltpu.CompilerParams(
            dimension_semantics=("parallel", "arbitrary"),
            vmem_limit_bytes=32 * 1024 * 1024,
        ),
        cost_estimate=cost,
    )(x2, t2)

    # Final cross-core + cross-lane reduction (tiny) done outside the kernel.
    return jnp.sum(partials) / jnp.float32(numel)


def focal_loss_ref(inputs, targets, alpha=ALPHA, gamma=GAMMA):
    x = inputs.astype(jnp.float32)
    t = targets.astype(jnp.float32)
    bce = jnp.maximum(x, 0.0) - x * t + jnp.log1p(jnp.exp(-jnp.abs(x)))
    at = alpha * t + (1 - alpha) * (1 - t)
    pt = jnp.exp(-bce)
    return jnp.mean(at * (1 - pt) ** gamma * bce)


if __name__ == "__main__":
    key = jax.random.PRNGKey(0)
    k1, k2 = jax.random.split(key)
    # NCHW, small shapes: batch=2, channels=4, spatial=16x16
    logits = jax.random.normal(k1, (2, 4, 16, 16), dtype=jnp.float32)
    targets = (jax.random.uniform(k2, (2, 4, 16, 16)) > 0.5).astype(jnp.float32)

    out = focal_loss_mean(logits, targets)
    out = jax.block_until_ready(out)

    ref = focal_loss_ref(logits, targets)
    assert jnp.allclose(out, ref, rtol=1e-5, atol=1e-6), (out, ref)

    # Larger shape to exercise the big-tile / multi-core path.
    k3, k4 = jax.random.split(k2)
    logits2 = jax.random.normal(k3, (2, 4, 64, 64), dtype=jnp.float32)
    targets2 = (jax.random.uniform(k4, (2, 4, 64, 64)) > 0.5).astype(jnp.float32)
    out2 = jax.block_until_ready(focal_loss_mean(logits2, targets2))
    ref2 = focal_loss_ref(logits2, targets2)
    assert jnp.allclose(out2, ref2, rtol=1e-5, atol=1e-6), (out2, ref2)

    print("KERNEL_OK")
</pallas_src>

<mosaic_0001>
module attributes {stable_mosaic.version = 11 : i64} {
  func.func @_focal_loss_kernel(%arg0: i32, %arg1: i32, %arg2: memref<16x128xf32, #tpu.memory_space<vmem>>, %arg3: memref<16x128xf32, #tpu.memory_space<vmem>>, %arg4: memref<1x8x128xf32, #tpu.memory_space<vmem>>, %arg5: memref<8x128xf32, #tpu.memory_space<vmem>>) attributes {dimension_semantics = [#tpu.dimension_semantics<parallel>, #tpu.dimension_semantics<arbitrary>], iteration_bounds = array<i64: 1, 1>, scalar_prefetch = 0 : i64, scratch_operands = 1 : i64, tpu.core_type = #tpu.core_type<tc>, window_params = [{transform_indices = @transform_0, window_bounds = array<i64: 16, 128>}, {transform_indices = @transform_1, window_bounds = array<i64: 16, 128>}, {transform_indices = @transform_2, window_bounds = array<i64: 1, 8, 128>}]} {
    %c0_i32 = arith.constant 0 : i32
    %0 = arith.cmpi eq, %arg1, %c0_i32 : i32
    %1 = arith.extui %0 : i1 to i32
    %c0_i32_0 = arith.constant 0 : i32
    %2 = arith.cmpi ne, %1, %c0_i32_0 : i32
    scf.if %2 {
      %cst_17 = arith.constant 0.000000e+00 : f32
      %38 = vector.broadcast %cst_17 : f32 to vector<8x128xf32>
      %c0_18 = arith.constant 0 : index
      %c0_19 = arith.constant 0 : index
      %39 = vector.load %arg5[%c0_18, %c0_19] : memref<8x128xf32, #tpu.memory_space<vmem>>, vector<8x128xf32>
      tpu.vector_store %arg5[%c0_18, %c0_19], %38 {strides = array<i32>} : memref<8x128xf32, #tpu.memory_space<vmem>>, vector<8x128xf32>,
    } else {
    }
    %c0 = arith.constant 0 : index
    %c0_1 = arith.constant 0 : index
    %3 = vector.load %arg2[%c0, %c0_1] : memref<16x128xf32, #tpu.memory_space<vmem>>, vector<16x128xf32>
    %c0_2 = arith.constant 0 : index
    %c0_3 = arith.constant 0 : index
    %4 = vector.load %arg3[%c0_2, %c0_3] : memref<16x128xf32, #tpu.memory_space<vmem>>, vector<16x128xf32>
    %cst = arith.constant 0.000000e+00 : f32
    %5 = vector.broadcast %cst : f32 to vector<16x128xf32>
    %6 = arith.maximumf %3, %5 : vector<16x128xf32>
    %7 = arith.mulf %3, %4 : vector<16x128xf32>
    %8 = arith.subf %6, %7 : vector<16x128xf32>
    %9 = math.absf %3 : vector<16x128xf32>
    %cst_4 = arith.constant 0.000000e+00 : f32
    %10 = vector.broadcast %cst_4 : f32 to vector<16x128xf32>
    %11 = arith.subf %10, %9 : vector<16x128xf32>
    %12 = math.exp %11 : vector<16x128xf32>
    %13 = math.log1p %12 : vector<16x128xf32>
    %14 = arith.addf %8, %13 : vector<16x128xf32>
    %cst_5 = arith.constant 2.500000e-01 : f32
    %15 = vector.broadcast %cst_5 : f32 to vector<16x128xf32>
    %16 = arith.mulf %15, %4 : vector<16x128xf32>
    %cst_6 = arith.constant 1.000000e+00 : f32
    %17 = vector.broadcast %cst_6 : f32 to vector<16x128xf32>
    %18 = arith.subf %17, %4 : vector<16x128xf32>
    %cst_7 = arith.constant 7.500000e-01 : f32
    %19 = vector.broadcast %cst_7 : f32 to vector<16x128xf32>
    %20 = arith.mulf %19, %18 : vector<16x128xf32>
    %21 = arith.addf %16, %20 : vector<16x128xf32>
    %cst_8 = arith.constant 0.000000e+00 : f32
    %22 = vector.broadcast %cst_8 : f32 to vector<16x128xf32>
    %23 = arith.subf %22, %14 : vector<16x128xf32>
    %24 = math.exp %23 : vector<16x128xf32>
    %cst_9 = arith.constant 1.000000e+00 : f32
    %25 = vector.broadcast %cst_9 : f32 to vector<16x128xf32>
    %26 = arith.subf %25, %24 : vector<16x128xf32>
    %27 = arith.mulf %26, %26 : vector<16x128xf32>
    %28 = arith.mulf %21, %27 : vector<16x128xf32>
    %29 = arith.mulf %28, %14 : vector<16x128xf32>
    %c0_10 = arith.constant 0 : index
    %c0_11 = arith.constant 0 : index
    %30 = vector.load %arg5[%c0_10, %c0_11] : memref<8x128xf32, #tpu.memory_space<vmem>>, vector<8x128xf32>
    %31 = vector.shape_cast %29 : vector<16x128xf32> to vector<2x8x128xf32>
    %cst_12 = arith.constant dense<0.000000e+00> : vector<8x128xf32>
    %32 = vector.multi_reduction <add>, %31, %cst_12 [0] : vector<2x8x128xf32> to vector<8x128xf32>
    %33 = arith.addf %30, %32 : vector<8x128xf32>
    %c0_13 = arith.constant 0 : index
    %c0_14 = arith.constant 0 : index
    %34 = vector.load %arg5[%c0_13, %c0_14] : memref<8x128xf32, #tpu.memory_space<vmem>>, vector<8x128xf32>
    tpu.vector_store %arg5[%c0_13, %c0_14], %33 {strides = array<i32>} : memref<8x128xf32, #tpu.memory_space<vmem>>, vector<8x128xf32>,
    %c0_i32_15 = arith.constant 0 : i32
    %35 = arith.cmpi eq, %arg1, %c0_i32_15 : i32
    %36 = arith.extui %35 : i1 to i32
    %c0_i32_16 = arith.constant 0 : i32
    %37 = arith.cmpi ne, %36, %c0_i32_16 : i32
    scf.if %37 {
      %c0_17 = arith.constant 0 : index
      %c0_18 = arith.constant 0 : index
      %38 = vector.load %arg5[%c0_17, %c0_18] : memref<8x128xf32, #tpu.memory_space<vmem>>, vector<8x128xf32>
      %39 = vector.shape_cast %38 : vector<8x128xf32> to vector<1x8x128xf32>
      %c0_19 = arith.constant 0 : index
      %c0_20 = arith.constant 0 : index
      %c0_21 = arith.constant 0 : index
      %40 = vector.load %arg4[%c0_19, %c0_20, %c0_21] : memref<1x8x128xf32, #tpu.memory_space<vmem>>, vector<1x8x128xf32>
      tpu.vector_store %arg4[%c0_19, %c0_20, %c0_21], %39 {strides = array<i32>} : memref<1x8x128xf32, #tpu.memory_space<vmem>>, vector<1x8x128xf32>,
    } else {
    }
    return
  }
  func.func @transform_0(%arg0: i32, %arg1: i32) -> (i32, i32) {
    %c1_i32 = arith.constant 1 : i32
    %0 = arith.muli %arg0, %c1_i32 : i32
    %1 = arith.addi %0, %arg1 : i32
    %c0_i32 = arith.constant 0 : i32
    %c0_i32_0 = arith.constant 0 : i32
    return %1, %c0_i32 : i32, i32
  }
  func.func @transform_1(%arg0: i32, %arg1: i32) -> (i32, i32) {
    %c1_i32 = arith.constant 1 : i32
    %0 = arith.muli %arg0, %c1_i32 : i32
    %1 = arith.addi %0, %arg1 : i32
    %c0_i32 = arith.constant 0 : i32
    %c0_i32_0 = arith.constant 0 : i32
    return %1, %c0_i32 : i32, i32
  }
  func.func @transform_2(%arg0: i32, %arg1: i32) -> (i32, i32, i32) {
    %c0_i32 = arith.constant 0 : i32
    %c0_i32_0 = arith.constant 0 : i32
    %c0_i32_1 = arith.constant 0 : i32
    return %arg0, %c0_i32, %c0_i32_0 : i32, i32, i32
  }
}

</mosaic_0001>

<bundles_post_ra>
// kernel: focal_loss_mean.1
= control target key start
LH: loop header
LB: loop body
LE: loop exit
PB: predicated region body
PF: predicated region fallthrough
CT: control target
= control target key end

     0   :  { %s187_s0 = inlined_call_operand.vmem [shape: f32[16,128], index: 0, kind: input, shape index: {}]   ;;  %s188_s1 = inlined_call_operand.vmem [shape: f32[16,128], index: 1, kind: input, shape index: {}]   ;;  %s189_s2 = inlined_call_operand.vmem [shape: f32[1,8,128], index: 2, kind: output, shape index: {}]  }
   0x1   :  { %v60_v0 = vld [vmem:[%s187_s0] sm:$0xff]  ;;  %v61_v1 = vld [vmem:[%s187_s0 + $0x8] sm:$0xff] }
   0x2   :  { %v70_v2 = vand.u32 2147483647, %v60_v0  ;;  %v71_v3 = vand.u32 2147483647, %v61_v1  ;;  %v62_v14 = vld [vmem:[%s188_s1] sm:$0xff]  ;;  %v63_v15 = vld [vmem:[%s188_s1 + $0x8] sm:$0xff] }
   0x3   :  { %v64_v17 = vmax.f32 %v60_v0, 0.0  ;;  %v66_v18 = vmul.f32 %v62_v14, %v60_v0  ;;  %v65_v21 = vmax.f32 %v61_v1, 0.0  ;;  %v67_v22 = vmul.f32 %v63_v15, %v61_v1 }
   0x4   :  { %v72_v4 = vsub.f32 0.0, %v70_v2  ;;  %v73_v5 = vsub.f32 0.0, %v71_v3  ;;  %v100_v40 = vsub.f32 1.0, %v62_v14  ;;  %v101_v41 = vsub.f32 1.0, %v63_v15 }
   0x5   :  { %v68_v26 = vsub.f32 %v64_v17, %v66_v18  ;;  %v69_v29 = vsub.f32 %v65_v21, %v67_v22  ;;  %v98_v42 = vmul.f32 0.25, %v62_v14  ;;  %v99_v44 = vmul.f32 0.25, %v63_v15 }
   0x6   :  { %v74_v6 = vmul.f32 1.442695, %v72_v4  ;;  %v76_v7 = vmul.f32 1.442695, %v73_v5  ;;  %v102_v43 = vmul.f32 0.75, %v100_v40  ;;  %v103_v45 = vmul.f32 0.75, %v101_v41 }
   0x8   :  { %145 = vpow2.f32 %v74_v6  ;;  %v104_v48 = vadd.f32 %v102_v43, %v98_v42  ;;  %v105_v50 = vadd.f32 %v103_v45, %v99_v44 }
   0x9   :  { %147 = vpow2.f32 %v76_v7 }
  0x12   :  { %v146_v8 = vpop.eup %145 }
  0x13   :  { %v148_v9 = vpop.eup %147  ;;  %v78_v10 = vadd.f32 1.0, %v146_v8  ;;  %v81_v12 = vmul.f32 -0.5, %v146_v8  ;;  %v84_v19 = vand.u32 2147483647, %v146_v8 }
  0x14   :  { %v87_v11 = vadd.f32 1.0, %v148_v9  ;;  %v90_v13 = vmul.f32 -0.5, %v148_v9  ;;  %v93_v23 = vand.u32 2147483647, %v148_v9 }
  0x15   :  { %149 = vlog2.f32 %v78_v10  ;;  %v82_v16 = vadd.f32 1.0, %v81_v12  ;;  %vm85_vm0 = vcmp.lt.f32.partialorder %v84_v19, 0.0004427343 }
  0x16   :  { %151 = vlog2.f32 %v87_v11  ;;  %v91_v20 = vadd.f32 1.0, %v90_v13  ;;  %vm94_vm1 = vcmp.lt.f32.partialorder %v93_v23, 0.0004427343 }
  0x17   :  { %v83_v24 = vmul.f32 %v146_v8, %v82_v16 }
  0x18   :  { %v92_v27 = vmul.f32 %v148_v9, %v91_v20 }
  0x1f   :  { %v150_v25 = vpop.eup %149 }
  0x20   :  { %v152_v28 = vpop.eup %151  ;;  %v80_v30 = vmul.f32 0.6931472, %v150_v25 }
  0x21   :  { %v89_v31 = vmul.f32 0.6931472, %v152_v28 }
  0x22   :  { %v86_v32 = vsel %vm85_vm0, %v83_v24, %v80_v30 }
  0x23   :  { %v95_v33 = vsel %vm94_vm1, %v92_v27, %v89_v31  ;;  %v96_v34 = vadd.f32 %v86_v32, %v68_v26 }
  0x24   :  { %v97_v35 = vadd.f32 %v95_v33, %v69_v29 }
  0x25   :  { %v106_v36 = vsub.f32 0.0, %v96_v34 }
  0x26   :  { %v107_v37 = vsub.f32 0.0, %v97_v35 }
  0x27   :  { %v108_v38 = vmul.f32 1.442695, %v106_v36 }
  0x28   :  { %v110_v39 = vmul.f32 1.442695, %v107_v37 }
  0x29   :  { %153 = vpow2.f32 %v108_v38 }
  0x2a   :  { %155 = vpow2.f32 %v110_v39 }
  0x33   :  { %v154_v46 = vpop.eup %153 }
  0x34   :  { %v156_v47 = vpop.eup %155  ;;  %v112_v49 = vsub.f32 1.0, %v154_v46 }
  0x35   :  { %v113_v51 = vsub.f32 1.0, %v156_v47 }
  0x36   :  { %v114_v52 = vmul.f32 %v112_v49, %v112_v49 }
  0x37   :  { %v115_v53 = vmul.f32 %v113_v51, %v113_v51 }
  0x38   :  { %v116_v54 = vmul.f32 %v114_v52, %v104_v48 }
  0x39   :  { %v117_v55 = vmul.f32 %v115_v53, %v105_v50 }
  0x3a   :  { %v118_v56 = vmul.f32 %v116_v54, %v96_v34 }
  0x3b   :  { %v119_v57 = vmul.f32 %v117_v55, %v97_v35 }
  0x3d   :  { %v121_v58 = vadd.f32 %v119_v57, %v118_v56 }
  0x3f   :  { %128 = vst [vmem:[%s189_s2] sm:$0xff] %v121_v58 }

</bundles_post_ra>
